<compile_context>
chip_gen: v7x
topology: tpu7x:2x2x1
jax: 0.10.0
libtpu: 0.0.40
codegen_flags: <defaults>
</compile_context>

<pallas_src>
import functools

import jax
import jax.numpy as jnp
from jax.experimental import pallas as pl
from jax.experimental.pallas import tpu as pltpu

_EPS = 1e-12
_NEG_BIG = -1e9


def _normalize_f32(x_f32):
    """Row-wise L2 normalize (f32 in, f32 out)."""
    return x_f32 * jax.lax.rsqrt(
        jnp.sum(x_f32 * x_f32, axis=-1, keepdims=True) + jnp.float32(_EPS)
    )


def _prep_kernel(txt_ref, *rest, n_banks):
    """Per row tile: normalize txt and (concatenated) vis ONCE, emit the
    normalized embeddings in the MXU compute dtype and the positive-pair
    cosine score d[r] = <txt_n[r], vis_n[r]> in f32."""
    vis_refs = rest[:n_banks]
    txtn_ref, visn_ref, d_ref = rest[n_banks:n_banks + 3]

    txt = txt_ref[...].astype(jnp.float32)
    vis = jnp.concatenate([r[...].astype(jnp.float32) for r in vis_refs], axis=-1)

    txt_n = _normalize_f32(txt)
    vis_n = _normalize_f32(vis)

    txtn_ref[...] = txt_n.astype(txtn_ref.dtype)
    visn_ref[...] = vis_n.astype(visn_ref.dtype)
    d_ref[...] = jnp.sum(txt_n * vis_n, axis=-1, keepdims=True)   # (tq, 1), f32


def _sim_loss_kernel(txtn_ref, visn_ref, dcol_ref, drow_ref,
                     sim_ref, rowmax_ref, colmax_ref,
                     rowmax_scr,
                     *, margin, tq, tv, b_real, vis_resident, has_pad):
    """One (txt tile, vis tile) block of the cosine-sim matrix + hinge maxima.
    Inputs are already L2-normalized bf16; no per-tile normalize/concat."""
    i = pl.program_id(0)
    j = pl.program_id(1)
    n_j = pl.num_programs(1)

    @pl.when(j == 0)
    def _():
        rowmax_scr[...] = jnp.zeros_like(rowmax_scr)

    txt_n = txtn_ref[...]                                    # (tq, D) bf16
    if vis_resident:
        start = pl.multiple_of(j * tv, tv)
        vis_n = visn_ref[pl.ds(start, tv), :]                # slice resident block
    else:
        vis_n = visn_ref[...]                                # streamed (tv, D) tile

    # (tq, D) . (tv, D) contracted on the last (lane) dim -> (tq, tv).
    # bf16 operands, f32 accumulation; no transpose feeds the MXU.
    sim = jax.lax.dot_general(
        txt_n, vis_n,
        dimension_numbers=(((1,), (1,)), ((), ())),
        preferred_element_type=jnp.float32,
    )
    sim_ref[...] = sim

    # --- hinge-cost version of sim: neutralize padded rows/cols + diagonal ---
    sim_cost = sim
    if has_pad:  # compiled in only when the batch was padded
        rr = i * tq + jax.lax.broadcasted_iota(jnp.int32, (tq, 1), 0)
        cc = j * tv + jax.lax.broadcasted_iota(jnp.int32, (1, tv), 1)
        pad = jnp.logical_or(rr >= b_real, cc >= b_real)
        sim_cost = jnp.where(pad, jnp.float32(_NEG_BIG), sim_cost)

    def _mask_diag(s):
        rr = i * tq + jax.lax.broadcasted_iota(jnp.int32, (tq, tv), 0)
        cc = j * tv + jax.lax.broadcasted_iota(jnp.int32, (tq, tv), 1)
        return jnp.where(rr == cc, jnp.float32(_NEG_BIG), s)

    # Only diagonal tiles (i == j, tq == tv) contain positive pairs.
    sim_cost = jax.lax.cond(i == j, _mask_diag, lambda s: s, sim_cost)

    m = jnp.float32(margin)
    d_i = dcol_ref[...]            # (tq, 1): positive score per txt row
    d_j = drow_ref[...]            # (1, tv): positive score per vis column

    cost_s = jnp.maximum(m + sim_cost - d_i, 0.0)   # caption -> video
    cost_v = jnp.maximum(m + sim_cost - d_j, 0.0)   # video -> caption

    # caption->video: running hardest-negative per txt row, kept in VMEM scratch.
    rowmax_scr[...] = jnp.maximum(rowmax_scr[...],
                                  jnp.max(cost_s, axis=1, keepdims=True))
    # video->caption: per-(i,j) partial column max, reduced by a tiny epilogue
    # so the txt axis can stay 'parallel' (both v7x TensorCores used).
    colmax_ref[...] = jnp.max(cost_v, axis=0, keepdims=True).reshape(1, 1, tv)

    @pl.when(j == n_j - 1)
    def _():
        rowmax_ref[...] = rowmax_scr[...]


def _tile_for(b):
    """Tile size: 256 when it yields >= 2 row tiles (MXU-shaped, megacore), else 128."""
    return 256 if b >= 512 else 128


def w2vvpp_frozen_clip_forward(caption_feat_dict, vis_input, *, margin=0.2):
    """Forward pass: frozen-CLIP text passthrough, vis-bank glue, cosine sim,
    margin-ranking triplet loss. Returns (loss, loss_items, txt2vis_sim)."""
    # txt_net: frozen CLIPEncoder with precomputed encoding -> pass-through.
    txt_embs = caption_feat_dict["CLIP_encoding"]
    # vis_net: feature banks, concatenated along the feature dim in the prep kernel.
    vis_banks = list(vis_input.values())

    bt, d_txt = txt_embs.shape
    bv = vis_banks[0].shape[0]
    d_vis = sum(b.shape[1] for b in vis_banks)
    assert bt == bv, "triplet loss needs a paired (caption, video) batch"
    assert d_txt == d_vis, "cosine sim needs matching embedding dim"
    n_banks = len(vis_banks)

    # Normalized values are in [-1, 1]; force bf16 MXU operands (f32 accumulate).
    compute_dtype = jnp.bfloat16

    tile = _tile_for(bt)
    b_pad = ((bt + tile - 1) // tile) * tile
    has_pad = b_pad != bt
    if has_pad:
        txt_embs = jnp.pad(txt_embs, ((0, b_pad - bt), (0, 0)))
        vis_banks = [jnp.pad(v, ((0, b_pad - bv), (0, 0))) for v in vis_banks]
    tq = tv = tile
    n_i = b_pad // tq
    n_j = b_pad // tv

    # --- pass 1 (prep): normalize once, write txt_n / vis_n (bf16) and d (f32) ---
    prep = functools.partial(_prep_kernel, n_banks=n_banks)
    txt_n, vis_n, d_col = pl.pallas_call(
        prep,
        out_shape=(
            jax.ShapeDtypeStruct((b_pad, d_txt), compute_dtype),
            jax.ShapeDtypeStruct((b_pad, d_vis), compute_dtype),
            jax.ShapeDtypeStruct((b_pad, 1), jnp.float32),
        ),
        grid=(n_i,),
        in_specs=[pl.BlockSpec((tq, d_txt), lambda i: (i, 0))]
        + [pl.BlockSpec((tq, v.shape[1]), lambda i: (i, 0)) for v in vis_banks],
        out_specs=(
            pl.BlockSpec((tq, d_txt), lambda i: (i, 0)),
            pl.BlockSpec((tq, d_vis), lambda i: (i, 0)),
            pl.BlockSpec((tq, 1), lambda i: (i, 0)),
        ),
        compiler_params=pltpu.CompilerParams(dimension_semantics=("parallel",)),
    )(txt_embs, *vis_banks)
    d_row = d_col.reshape(1, b_pad)   # lane-major copy of the same scores

    # --- pass 2: tiled cosine-sim matrix + hinge maxima ---
    c_itemsize = jnp.dtype(compute_dtype).itemsize
    visn_bytes = b_pad * d_vis * c_itemsize
    # Resident vis_n cuts vis HBM traffic by n_i x; gate conservatively for
    # v7x's 64 MiB VMEM (double-buffered even when the block index is constant).
    vis_resident = visn_bytes <= 12 * 1024 * 1024

    sim_tile_bytes = tq * tv * 4
    txt_tile_bytes = tq * d_txt * c_itemsize
    vis_tile_bytes = tv * d_vis * c_itemsize
    if vis_resident:
        vis_spec = pl.BlockSpec((b_pad, d_vis), lambda i, j: (0, 0))
        vmem_budget = 2 * visn_bytes + 2 * (sim_tile_bytes + txt_tile_bytes)
    else:
        vis_spec = pl.BlockSpec((tv, d_vis), lambda i, j: (j, 0),
                                pipeline_mode=pl.Buffered(3))
        vmem_budget = 3 * vis_tile_bytes + 2 * (sim_tile_bytes + txt_tile_bytes)
    vmem_limit = int(max(32 * 1024 * 1024,
                         min(vmem_budget + 4 * 1024 * 1024, 48 * 1024 * 1024)))

    main = functools.partial(
        _sim_loss_kernel, margin=margin, tq=tq, tv=tv, b_real=bt,
        vis_resident=vis_resident, has_pad=has_pad)

    sim, rowmax, colmax = pl.pallas_call(
        main,
        out_shape=(
            jax.ShapeDtypeStruct((b_pad, b_pad), jnp.float32),    # similarity matrix
            jax.ShapeDtypeStruct((b_pad, 1), jnp.float32),        # caption->video hinge max
            jax.ShapeDtypeStruct((n_i, 1, b_pad), jnp.float32),   # video->caption partial max
        ),
        grid=(n_i, n_j),
        in_specs=[
            pl.BlockSpec((tq, d_txt), lambda i, j: (i, 0)),   # pre-normalized txt tile
            vis_spec,                                         # pre-normalized vis (resident/streamed)
            pl.BlockSpec((tq, 1), lambda i, j: (i, 0)),       # d for txt rows
            pl.BlockSpec((1, tv), lambda i, j: (0, j)),       # d for vis columns
        ],
        out_specs=(
            pl.BlockSpec((tq, tv), lambda i, j: (i, j)),
            pl.BlockSpec((tq, 1), lambda i, j: (i, 0)),
            pl.BlockSpec((1, 1, tv), lambda i, j: (i, 0, j)),
        ),
        scratch_shapes=[pltpu.VMEM((tq, 1), jnp.float32)],
        compiler_params=pltpu.CompilerParams(
            dimension_semantics=("parallel", "arbitrary"),
            vmem_limit_bytes=vmem_limit,
        ),
    )(txt_n, vis_n, d_col, d_row)

    # Tiny O(B + n_i*B) epilogue: combine partial maxima and sum the loss.
    cost_s_max = rowmax[:bt, 0]                       # (B,)
    cost_v_max = jnp.max(colmax[:, 0, :bt], axis=0)   # (B,)
    loss = jnp.sum(cost_s_max) + jnp.sum(cost_v_max)

    sim_out = sim[:bt, :bt] if has_pad else sim
    loss_items = {"triplet_loss": loss}
    return loss, loss_items, sim_out


def _reference(caption_feat_dict, vis_input, margin=0.2):
    """Pure-JAX f32 reference of the same math for a correctness check."""
    txt = caption_feat_dict["CLIP_encoding"].astype(jnp.float32)
    vis = jnp.concatenate(list(vis_input.values()), axis=1).astype(jnp.float32)
    txt_n = txt / jnp.sqrt(jnp.sum(txt * txt, -1, keepdims=True) + _EPS)
    vis_n = vis / jnp.sqrt(jnp.sum(vis * vis, -1, keepdims=True) + _EPS)
    sim = txt_n @ vis_n.T
    diag = jnp.diag(sim)[:, None]
    eye = jnp.eye(sim.shape[0], dtype=bool)
    cost_s = jnp.where(eye, 0.0, jnp.maximum(margin + sim - diag, 0.0))
    cost_v = jnp.where(eye, 0.0, jnp.maximum(margin + sim - diag.T, 0.0))
    loss = jnp.sum(jnp.max(cost_s, axis=1)) + jnp.sum(jnp.max(cost_v, axis=0))
    return loss, sim


if __name__ == "__main__":
    key = jax.random.PRNGKey(0)
    k_txt, k_v0, k_v1 = jax.random.split(key, 3)

    batch = 8       # paired (caption, video) batch
    clip_dim = 32   # small stand-in for CLIP's 512-d embedding

    # Precomputed (frozen) CLIP text encodings -> CLIPEncoder pass-through.
    caption_feat_dict = {
        "CLIP_encoding": jax.random.normal(k_txt, (batch, clip_dim), jnp.float32),
    }
    # Visual feature dict: two precomputed banks that concat to clip_dim.
    vis_input = {
        "clip_frame_feat_a": jax.random.normal(k_v0, (batch, clip_dim // 2), jnp.float32),
        "clip_frame_feat_b": jax.random.normal(k_v1, (batch, clip_dim // 2), jnp.float32),
    }

    loss, loss_items, sim = w2vvpp_frozen_clip_forward(
        caption_feat_dict, vis_input, margin=0.2
    )
    jax.block_until_ready((loss, sim))

    ref_loss, ref_sim = _reference(caption_feat_dict, vis_input, margin=0.2)
    # bf16 MXU operands -> ~2^-8 per-entry error vs. the pure-f32 reference.
    assert jnp.allclose(sim, ref_sim, atol=2e-2), "sim mismatch"
    assert jnp.allclose(loss, ref_loss, atol=1.5e-1, rtol=5e-2), "loss mismatch"

    print("KERNEL_OK")
</pallas_src>

<mosaic_0001>
module attributes {stable_mosaic.version = 11 : i64} {
  func.func @_prep_kernel(%arg0: i32, %arg1: memref<128x32xf32, #tpu.memory_space<vmem>>, %arg2: memref<128x16xf32, #tpu.memory_space<vmem>>, %arg3: memref<128x16xf32, #tpu.memory_space<vmem>>, %arg4: memref<128x32xbf16, #tpu.memory_space<vmem>>, %arg5: memref<128x32xbf16, #tpu.memory_space<vmem>>, %arg6: memref<128x1xf32, #tpu.memory_space<vmem>>) attributes {dimension_semantics = [#tpu.dimension_semantics<parallel>], iteration_bounds = array<i64: 1>, scalar_prefetch = 0 : i64, scratch_operands = 0 : i64, tpu.core_type = #tpu.core_type<tc>, window_params = [{transform_indices = @transform_0, window_bounds = array<i64: 128, 32>}, {transform_indices = @transform_1, window_bounds = array<i64: 128, 16>}, {transform_indices = @transform_2, window_bounds = array<i64: 128, 16>}, {transform_indices = @transform_3, window_bounds = array<i64: 128, 32>}, {transform_indices = @transform_4, window_bounds = array<i64: 128, 32>}, {transform_indices = @transform_5, window_bounds = array<i64: 128, 1>}]} {
    %c0 = arith.constant 0 : index
    %c0_0 = arith.constant 0 : index
    %0 = vector.load %arg1[%c0, %c0_0] : memref<128x32xf32, #tpu.memory_space<vmem>>, vector<128x32xf32>
    %c0_1 = arith.constant 0 : index
    %c0_2 = arith.constant 0 : index
    %1 = vector.load %arg2[%c0_1, %c0_2] : memref<128x16xf32, #tpu.memory_space<vmem>>, vector<128x16xf32>
    %c0_3 = arith.constant 0 : index
    %c0_4 = arith.constant 0 : index
    %2 = vector.load %arg3[%c0_3, %c0_4] : memref<128x16xf32, #tpu.memory_space<vmem>>, vector<128x16xf32>
    %3 = tpu.concatenate %1, %2 in 1 : vector<128x16xf32>, vector<128x16xf32> -> vector<128x32xf32>
    %4 = arith.mulf %0, %0 : vector<128x32xf32>
    %cst = arith.constant dense<0.000000e+00> : vector<128xf32>
    %5 = vector.multi_reduction <add>, %4, %cst [1] : vector<128x32xf32> to vector<128xf32>
    %6 = vector.shape_cast %5 : vector<128xf32> to vector<128x1xf32>
    %cst_5 = arith.constant 9.99999996E-13 : f32
    %7 = vector.broadcast %cst_5 : f32 to vector<128x1xf32>
    %8 = arith.addf %6, %7 : vector<128x1xf32>
    %9 = math.rsqrt %8 : vector<128x1xf32>
    %10 = vector.broadcast %9 : vector<128x1xf32> to vector<128x32xf32>
    %11 = arith.mulf %0, %10 : vector<128x32xf32>
    %12 = arith.mulf %3, %3 : vector<128x32xf32>
    %cst_6 = arith.constant dense<0.000000e+00> : vector<128xf32>
    %13 = vector.multi_reduction <add>, %12, %cst_6 [1] : vector<128x32xf32> to vector<128xf32>
    %14 = vector.shape_cast %13 : vector<128xf32> to vector<128x1xf32>
    %cst_7 = arith.constant 9.99999996E-13 : f32
    %15 = vector.broadcast %cst_7 : f32 to vector<128x1xf32>
    %16 = arith.addf %14, %15 : vector<128x1xf32>
    %17 = math.rsqrt %16 : vector<128x1xf32>
    %18 = vector.broadcast %17 : vector<128x1xf32> to vector<128x32xf32>
    %19 = arith.mulf %3, %18 : vector<128x32xf32>
    %20 = arith.truncf %11 : vector<128x32xf32> to vector<128x32xbf16>
    %c0_8 = arith.constant 0 : index
    %c0_9 = arith.constant 0 : index
    %21 = vector.load %arg4[%c0_8, %c0_9] : memref<128x32xbf16, #tpu.memory_space<vmem>>, vector<128x32xbf16>
    tpu.vector_store %arg4[%c0_8, %c0_9], %20 {strides = array<i32>} : memref<128x32xbf16, #tpu.memory_space<vmem>>, vector<128x32xbf16>,
    %22 = arith.truncf %19 : vector<128x32xf32> to vector<128x32xbf16>
    %c0_10 = arith.constant 0 : index
    %c0_11 = arith.constant 0 : index
    %23 = vector.load %arg5[%c0_10, %c0_11] : memref<128x32xbf16, #tpu.memory_space<vmem>>, vector<128x32xbf16>
    tpu.vector_store %arg5[%c0_10, %c0_11], %22 {strides = array<i32>} : memref<128x32xbf16, #tpu.memory_space<vmem>>, vector<128x32xbf16>,
    %24 = arith.mulf %11, %19 : vector<128x32xf32>
    %cst_12 = arith.constant dense<0.000000e+00> : vector<128xf32>
    %25 = vector.multi_reduction <add>, %24, %cst_12 [1] : vector<128x32xf32> to vector<128xf32>
    %26 = vector.shape_cast %25 : vector<128xf32> to vector<128x1xf32>
    %c0_13 = arith.constant 0 : index
    %c0_14 = arith.constant 0 : index
    %27 = vector.load %arg6[%c0_13, %c0_14] : memref<128x1xf32, #tpu.memory_space<vmem>>, vector<128x1xf32>
    tpu.vector_store %arg6[%c0_13, %c0_14], %26 {strides = array<i32>} : memref<128x1xf32, #tpu.memory_space<vmem>>, vector<128x1xf32>,
    return
  }
  func.func @transform_0(%arg0: i32) -> (i32, i32) {
    %c0_i32 = arith.constant 0 : i32
    %c0_i32_0 = arith.constant 0 : i32
    return %arg0, %c0_i32 : i32, i32
  }
  func.func @transform_1(%arg0: i32) -> (i32, i32) {
    %c0_i32 = arith.constant 0 : i32
    %c0_i32_0 = arith.constant 0 : i32
    return %arg0, %c0_i32 : i32, i32
  }
  func.func @transform_2(%arg0: i32) -> (i32, i32) {
    %c0_i32 = arith.constant 0 : i32
    %c0_i32_0 = arith.constant 0 : i32
    return %arg0, %c0_i32 : i32, i32
  }
  func.func @transform_3(%arg0: i32) -> (i32, i32) {
    %c0_i32 = arith.constant 0 : i32
    %c0_i32_0 = arith.constant 0 : i32
    return %arg0, %c0_i32 : i32, i32
  }
  func.func @transform_4(%arg0: i32) -> (i32, i32) {
    %c0_i32 = arith.constant 0 : i32
    %c0_i32_0 = arith.constant 0 : i32
    return %arg0, %c0_i32 : i32, i32
  }
  func.func @transform_5(%arg0: i32) -> (i32, i32) {
    %c0_i32 = arith.constant 0 : i32
    %c0_i32_0 = arith.constant 0 : i32
    return %arg0, %c0_i32 : i32, i32
  }
}

</mosaic_0001>

<bundles_post_ra>
// kernel: tpu_custom_call.1
= control target key start
LH: loop header
LB: loop body
LE: loop exit
PB: predicated region body
PF: predicated region fallthrough
CT: control target
= control target key end

     0   :  { %s754_s22 = smov 16   ;;  %vm162_vm0 = vcmask 261120   ;;  %vm129_vm1 = vcmask 130048   ;;  %vm435_vm2 = vcmask 257024   ;;  %vm596_vm3 = vcmask 7168   ;;  %s1425_s2 = inlined_call_operand.vmem [shape: f32[128,16], index: 2, kind: input, shape index: {}]   ;;  %s1426_s0 = inlined_call_operand.vmem [shape: f32[128,32], index: 0, kind: input, shape index: {}]   ;;  %s1427_s1 = inlined_call_operand.vmem [shape: f32[128,16], index: 1, kind: input, shape index: {}]   ;;  %s1428_s3 = inlined_call_operand.vmem [shape: bf16[128,32], index: 3, kind: output, shape index: {0}]   ;;  %s1429_s4 = inlined_call_operand.vmem [shape: bf16[128,32], index: 4, kind: output, shape index: {1}]   ;;  %s1430_s5 = inlined_call_operand.vmem [shape: f32[128,1], index: 5, kind: output, shape index: {2}]  }
   0x1   :  { %v49_v0 = vld [vmem:[%s1425_s2] sm:$0xff]  ;;  %v51_v1 = vld [vmem:[%s1425_s2 + $0x10] sm:$0xff]  ;;  %v50_v2 = vld [vmem:[%s1425_s2 + $0x8] sm:$0xff] }
   0x2   :  { %81 = vrot.lane.b32.xlu0 %v49_v0, %s754_s22  ;;  %85 = vrot.lane.b32.xlu1 %v51_v1, %s754_s22  ;;  %v52_v3 = vld [vmem:[%s1425_s2 + $0x18] sm:$0xff]  ;;  %v53_v4 = vld [vmem:[%s1425_s2 + $0x20] sm:$0xff] }
   0x3   :  { %v54_v5 = vld [vmem:[%s1425_s2 + $0x28] sm:$0xff]  ;;  %v55_v6 = vld [vmem:[%s1425_s2 + $0x30] sm:$0xff]  ;;  %v56_v7 = vld [vmem:[%s1425_s2 + $0x38] sm:$0xff] }
   0x4   :  { %v57_v8 = vld [vmem:[%s1425_s2 + $0x40] sm:$0xff]  ;;  %v58_v9 = vld [vmem:[%s1425_s2 + $0x48] sm:$0xff]  ;;  %v59_v10 = vld [vmem:[%s1425_s2 + $0x50] sm:$0xff] }
   0x5   :  { %v60_v11 = vld [vmem:[%s1425_s2 + $0x58] sm:$0xff]  ;;  %v61_v12 = vld [vmem:[%s1425_s2 + $0x60] sm:$0xff]  ;;  %v62_v13 = vld [vmem:[%s1425_s2 + $0x68] sm:$0xff] }
   0x6   :  { %83 = vrot.lane.b32.xlu0 %v50_v2, %s754_s22  ;;  %87 = vrot.lane.b32.xlu1 %v52_v3, %s754_s22  ;;  %v63_v14 = vld [vmem:[%s1425_s2 + $0x70] sm:$0xff]  ;;  %v64_v15 = vld [vmem:[%s1425_s2 + $0x78] sm:$0xff] }
   0x7   :  { %v836_v16 = vld [vmem:[%s1426_s0] sm:$0xff]  ;;  %v843_v18 = vld [vmem:[%s1426_s0 + $0x10] sm:$0xff]  ;;  %v848_v19 = vld [vmem:[%s1426_s0 + $0x8] sm:$0xff] }
   0x8   :  { %v146_v17 = vmul.f32 %v836_v16, %v836_v16  ;;  %v148_v21 = vmul.f32 %v843_v18, %v843_v18  ;;  %v147_v22 = vmul.f32 %v848_v19, %v848_v19  ;;  %v858_v23 = vld [vmem:[%s1426_s0 + $0x18] sm:$0xff]  ;;  %v863_v24 = vld [vmem:[%s1426_s0 + $0x20] sm:$0xff]  ;;  %v874_v29 = vld [vmem:[%s1426_s0 + $0x28] sm:$0xff] }
   0x9   :  { %v149_v26 = vmul.f32 %v858_v23, %v858_v23  ;;  %v150_v28 = vmul.f32 %v863_v24, %v863_v24  ;;  %v879_v30 = vld [vmem:[%s1426_s0 + $0x30] sm:$0xff]  ;;  %v151_v32 = vmul.f32 %v874_v29, %v874_v29  ;;  %v890_v35 = vld [vmem:[%s1426_s0 + $0x38] sm:$0xff]  ;;  %v895_v36 = vld [vmem:[%s1426_s0 + $0x40] sm:$0xff] }
   0xa   :  { %89 = vrot.lane.b32.xlu0 %v53_v4, %s754_s22  ;;  %91 = vrot.lane.b32.xlu1 %v54_v5, %s754_s22  ;;  %v163_v20 = vsel %vm162_vm0, %v146_v17, 0.0  ;;  %v169_v25 = vsel %vm162_vm0, %v148_v21, 0.0  ;;  %v166_v27 = vsel %vm162_vm0, %v147_v22, 0.0  ;;  %v152_v34 = vmul.f32 %v879_v30, %v879_v30  ;;  %v906_v41 = vld [vmem:[%s1426_s0 + $0x48] sm:$0xff]  ;;  %v911_v42 = vld [vmem:[%s1426_s0 + $0x50] sm:$0xff] }
   0xb   :  { %v172_v31 = vsel %vm162_vm0, %v149_v26, 0.0  ;;  %v175_v33 = vsel %vm162_vm0, %v150_v28, 0.0  ;;  %v178_v37 = vsel %vm162_vm0, %v151_v32, 0.0  ;;  %v153_v38 = vmul.f32 %v890_v35, %v890_v35  ;;  %v922_v47 = vld [vmem:[%s1426_s0 + $0x58] sm:$0xff]  ;;  %v927_v48 = vld [vmem:[%s1426_s0 + $0x60] sm:$0xff]  ;;  %v938_v53 = vld [vmem:[%s1426_s0 + $0x68] sm:$0xff] }
   0xc   :  { %v181_v39 = vsel %vm162_vm0, %v152_v34, 0.0  ;;  %v154_v40 = vmul.f32 %v895_v36, %v895_v36  ;;  %v155_v44 = vmul.f32 %v906_v41, %v906_v41  ;;  %v156_v46 = vmul.f32 %v911_v42, %v911_v42  ;;  %v943_v54 = vld [vmem:[%s1426_s0 + $0x70] sm:$0xff]  ;;  %v954_v59 = vld [vmem:[%s1426_s0 + $0x78] sm:$0xff]  ;;  %v33_v0 = vld [vmem:[%s1427_s1] sm:$0xff] }
   0xd   :  { %v184_v43 = vsel %vm162_vm0, %v153_v38, 0.0  ;;  %v157_v50 = vmul.f32 %v922_v47, %v922_v47  ;;  %v158_v52 = vmul.f32 %v927_v48, %v927_v48  ;;  %v159_v56 = vmul.f32 %v938_v53, %v938_v53  ;;  %v35_v1 = vld [vmem:[%s1427_s1 + $0x10] sm:$0xff]  ;;  %v38_v21 = vld [vmem:[%s1427_s1 + $0x28] sm:$0xff] }
   0xe   :  { %93 = vrot.lane.b32.xlu0 %v55_v6, %s754_s22  ;;  %95 = vrot.lane.b32.xlu1 %v56_v7, %s754_s22  ;;  %v187_v45 = vsel %vm162_vm0, %v154_v40, 0.0  ;;  %v190_v49 = vsel %vm162_vm0, %v155_v44, 0.0  ;;  %v193_v51 = vsel %vm162_vm0, %v156_v46, 0.0  ;;  %v160_v58 = vmul.f32 %v943_v54, %v943_v54  ;;  %v34_v6 = vld [vmem:[%s1427_s1 + $0x8] sm:$0xff]  ;;  %v39_v32 = vld [vmem:[%s1427_s1 + $0x30] sm:$0xff] }
   0xf   :  { %v196_v55 = vsel %vm162_vm0, %v157_v50, 0.0  ;;  %v199_v57 = vsel %vm162_vm0, %v158_v52, 0.0  ;;  %v202_v60 = vsel %vm162_vm0, %v159_v56, 0.0  ;;  %v161_v61 = vmul.f32 %v954_v59, %v954_v59  ;;  %v41_v46 = vld [vmem:[%s1427_s1 + $0x40] sm:$0xff] }
  0x10   :  { %v205_v62 = vsel %vm162_vm0, %v160_v58, 0.0 }
  0x11   :  { %v208_v63 = vsel %vm162_vm0, %v161_v61, 0.0  ;;  %v43_v61 = vld [vmem:[%s1427_s1 + $0x50] sm:$0xff] }
  0x12   :  { %97 = vrot.lane.b32.xlu0 %v57_v8, %s754_s22  ;;  %99 = vrot.lane.b32.xlu1 %v58_v9, %s754_s22  ;;  %v36_v8 = vld [vmem:[%s1427_s1 + $0x18] sm:$0xff] }
  0x16   :  { %101 = vrot.lane.b32.xlu0 %v59_v10, %s754_s22  ;;  %103 = vrot.lane.b32.xlu1 %v60_v11, %s754_s22 }
  0x1a   :  { %105 = vrot.lane.b32.xlu0 %v61_v12, %s754_s22  ;;  %107 = vrot.lane.b32.xlu1 %v62_v13, %s754_s22 }
  0x1e   :  { %109 = vrot.lane.b32.xlu0 %v63_v14, %s754_s22  ;;  %111 = vrot.lane.b32.xlu1 %v64_v15, %s754_s22  ;;  %v37_v15 = vld [vmem:[%s1427_s1 + $0x20] sm:$0xff] }
  0x3d   :  { %164 = vadd.xlane.f32.xlu0 %v163_v20 }
  0x41   :  { %170 = vadd.xlane.f32.xlu0 %v169_v25 }
  0x42   :  { %167 = vadd.xlane.f32.xlu1 %v166_v27 }
  0x45   :  { %173 = vadd.xlane.f32.xlu0 %v172_v31 }
  0x46   :  { %176 = vadd.xlane.f32.xlu1 %v175_v33 }
  0x49   :  { %179 = vadd.xlane.f32.xlu0 %v178_v37  ;;  %v40_v37 = vld [vmem:[%s1427_s1 + $0x38] sm:$0xff] }
  0x4a   :  { %182 = vadd.xlane.f32.xlu1 %v181_v39 }
  0x4d   :  { %185 = vadd.xlane.f32.xlu0 %v184_v43 }
  0x4e   :  { %188 = vadd.xlane.f32.xlu1 %v187_v45 }
  0x51   :  { %191 = vadd.xlane.f32.xlu0 %v190_v49 }
  0x52   :  { %194 = vadd.xlane.f32.xlu1 %v193_v51  ;;  %v42_v51 = vld [vmem:[%s1427_s1 + $0x48] sm:$0xff] }
  0x55   :  { %197 = vadd.xlane.f32.xlu0 %v196_v55 }
  0x56   :  { %200 = vadd.xlane.f32.xlu1 %v199_v57 }
  0x59   :  { %203 = vadd.xlane.f32.xlu0 %v202_v60 }
  0x5a   :  { %206 = vadd.xlane.f32.xlu1 %v205_v62 }
  0x5d   :  { %209 = vadd.xlane.f32.xlu0 %v208_v63 }
  0x74   :  { %v82_v2 = vpop.permute.xlu0 %81  ;;  %v86_v3 = vpop.permute.xlu1 %85 }
  0x75   :  { %v968_v4 = vsel %vm129_vm1, %v33_v0, %v82_v2  ;;  %v971_v5 = vsel %vm129_vm1, %v35_v1, %v86_v3  ;;  %v44_v0 = vld [vmem:[%s1427_s1 + $0x58] sm:$0xff] }
  0x76   :  { %v259_v7 = vmul.f32 %v968_v4, %v968_v4  ;;  %v261_v9 = vmul.f32 %v971_v5, %v971_v5 }
  0x78   :  { %v84_v10 = vpop.permute.xlu0 %83  ;;  %v275_v11 = vsel %vm162_vm0, %v259_v7, 0.0  ;;  %v88_v12 = vpop.permute.xlu1 %87  ;;  %v281_v17 = vsel %vm162_vm0, %v261_v9, 0.0  ;;  %v45_v9 = vld [vmem:[%s1427_s1 + $0x60] sm:$0xff] }
  0x79   :  { %v985_v13 = vsel %vm129_vm1, %v34_v6, %v84_v10  ;;  %276 = vadd.xlane.f32.xlu1 %v275_v11  ;;  %v988_v14 = vsel %vm129_vm1, %v36_v8, %v88_v12  ;;  %v46_v12 = vld [vmem:[%s1427_s1 + $0x68] sm:$0xff] }
  0x7a   :  { %v260_v20 = vmul.f32 %v985_v13, %v985_v13  ;;  %v262_v22 = vmul.f32 %v988_v14, %v988_v14 }
  0x7c   :  { %v90_v25 = vpop.permute.xlu0 %89  ;;  %v278_v26 = vsel %vm162_vm0, %v260_v20, 0.0  ;;  %v92_v27 = vpop.permute.xlu1 %91  ;;  %v284_v34 = vsel %vm162_vm0, %v262_v22, 0.0 }
  0x7d   :  { %v1003_v28 = vsel %vm129_vm1, %v37_v15, %v90_v25  ;;  %282 = vadd.xlane.f32.xlu1 %v281_v17  ;;  %279 = vadd.xlane.f32.xlu0 %v278_v26  ;;  %v1006_v31 = vsel %vm129_vm1, %v38_v21, %v92_v27  ;;  %v47_v26 = vld [vmem:[%s1427_s1 + $0x70] sm:$0xff] }
  0x7e   :  { %v263_v33 = vmul.f32 %v1003_v28, %v1003_v28  ;;  %v264_v38 = vmul.f32 %v1006_v31, %v1006_v31 }
  0x80   :  { %v94_v39 = vpop.permute.xlu0 %93  ;;  %v287_v40 = vsel %vm162_vm0, %v263_v33, 0.0  ;;  %v96_v43 = vpop.permute.xlu1 %95  ;;  %v290_v50 = vsel %vm162_vm0, %v264_v38, 0.0  ;;  %v48_v33 = vld [vmem:[%s1427_s1 + $0x78] sm:$0xff] }
  0x81   :  { %v1021_v44 = vsel %vm129_vm1, %v39_v32, %v94_v39  ;;  %288 = vadd.xlane.f32.xlu1 %v287_v40  ;;  %285 = vadd.xlane.f32.xlu0 %v284_v34  ;;  %v1024_v45 = vsel %vm129_vm1, %v40_v37, %v96_v43 }
  0x82   :  { %v265_v49 = vmul.f32 %v1021_v44, %v1021_v44  ;;  %v266_v52 = vmul.f32 %v1024_v45, %v1024_v45 }
  0x84   :  { %v98_v55 = vpop.permute.xlu0 %97  ;;  %v293_v56 = vsel %vm162_vm0, %v265_v49, 0.0  ;;  %v100_v57 = vpop.permute.xlu1 %99  ;;  %v296_v63 = vsel %vm162_vm0, %v266_v52, 0.0 }
  0x85   :  { %v1039_v58 = vsel %vm129_vm1, %v41_v46, %v98_v55  ;;  %294 = vadd.xlane.f32.xlu1 %v293_v56  ;;  %291 = vadd.xlane.f32.xlu0 %v290_v50  ;;  %v1042_v60 = vsel %vm129_vm1, %v42_v51, %v100_v57 }
  0x86   :  { %v267_v62 = vmul.f32 %v1039_v58, %v1039_v58  ;;  %v268_v1 = vmul.f32 %v1042_v60, %v1042_v60 }
  0x88   :  { %v102_v2 = vpop.permute.xlu0 %101  ;;  %v299_v3 = vsel %vm162_vm0, %v267_v62, 0.0  ;;  %v104_v6 = vpop.permute.xlu1 %103  ;;  %v302_v11 = vsel %vm162_vm0, %v268_v1, 0.0 }
  0x89   :  { %v1057_v7 = vsel %vm129_vm1, %v43_v61, %v102_v2  ;;  %300 = vadd.xlane.f32.xlu1 %v299_v3  ;;  %297 = vadd.xlane.f32.xlu0 %v296_v63  ;;  %v1060_v8 = vsel %vm129_vm1, %v44_v0, %v104_v6 }
  0x8a   :  { %v269_v10 = vmul.f32 %v1057_v7, %v1057_v7  ;;  %v270_v15 = vmul.f32 %v1060_v8, %v1060_v8 }
  0x8c   :  { %v106_v17 = vpop.permute.xlu0 %105  ;;  %v305_v20 = vsel %vm162_vm0, %v269_v10, 0.0  ;;  %v108_v21 = vpop.permute.xlu1 %107  ;;  %v308_v32 = vsel %vm162_vm0, %v270_v15, 0.0 }
  0x8d   :  { %v1075_v22 = vsel %vm129_vm1, %v45_v9, %v106_v17  ;;  %306 = vadd.xlane.f32.xlu1 %v305_v20  ;;  %303 = vadd.xlane.f32.xlu0 %v302_v11  ;;  %v1078_v25 = vsel %vm129_vm1, %v46_v12, %v108_v21 }
  0x8e   :  { %v271_v27 = vmul.f32 %v1075_v22, %v1075_v22  ;;  %v272_v34 = vmul.f32 %v1078_v25, %v1078_v25 }
  0x90   :  { %v110_v37 = vpop.permute.xlu0 %109  ;;  %v311_v38 = vsel %vm162_vm0, %v271_v27, 0.0  ;;  %v112_v39 = vpop.permute.xlu1 %111  ;;  %v314_v49 = vsel %vm162_vm0, %v272_v34, 0.0 }
  0x91   :  { %v1093_v40 = vsel %vm129_vm1, %v47_v26, %v110_v37  ;;  %312 = vadd.xlane.f32.xlu1 %v311_v38  ;;  %309 = vadd.xlane.f32.xlu0 %v308_v32  ;;  %v1096_v43 = vsel %vm129_vm1, %v48_v33, %v112_v39 }
  0x92   :  { %v273_v46 = vmul.f32 %v1093_v40, %v1093_v40  ;;  %v274_v50 = vmul.f32 %v1096_v43, %v1096_v43 }
  0x94   :  { %v317_v51 = vsel %vm162_vm0, %v273_v46, 0.0  ;;  %v320_v52 = vsel %vm162_vm0, %v274_v50, 0.0 }
  0x95   :  { %318 = vadd.xlane.f32.xlu1 %v317_v51  ;;  %315 = vadd.xlane.f32.xlu0 %v314_v49 }
  0x99   :  { %321 = vadd.xlane.f32.xlu0 %v320_v52 }
  0xca   :  { %v165_v55 = vpop.xlane.xlu0 %164 }
  0xcb   :  { %v211_v56 = vadd.f32 1e-12, %v165_v55 }
  0xcd   :  { %690 = vrsqrt.f32 %v211_v56 }
  0xce   :  { %v171_v57 = vpop.xlane.xlu0 %170 }
  0xcf   :  { %v168_v61 = vpop.xlane.xlu1 %167  ;;  %v213_v62 = vadd.f32 1e-12, %v171_v57 }
  0xd0   :  { %v212_v63 = vadd.f32 1e-12, %v168_v61 }
  0xd1   :  { %692 = vrsqrt.f32 %v213_v62 }
  0xd2   :  { %694 = vrsqrt.f32 %v212_v63  ;;  %v174_v0 = vpop.xlane.xlu0 %173 }
  0xd3   :  { %v177_v1 = vpop.xlane.xlu1 %176  ;;  %v214_v2 = vadd.f32 1e-12, %v174_v0 }
  0xd4   :  { %v215_v3 = vadd.f32 1e-12, %v177_v1 }
  0xd5   :  { %696 = vrsqrt.f32 %v214_v2 }
  0xd6   :  { %698 = vrsqrt.f32 %v215_v3  ;;  %v180_v6 = vpop.xlane.xlu0 %179 }
  0xd7   :  { %v691_v9 = vpop.eup %690  ;;  %v183_v10 = vpop.xlane.xlu1 %182  ;;  %v216_v11 = vadd.f32 1e-12, %v180_v6 }
  0xd8   :  { %v217_v12 = vadd.f32 1e-12, %v183_v10  ;;  %v1106_v15 = vmul.f32 %v691_v9, %v836_v16 }
  0xd9   :  { %700 = vrsqrt.f32 %v216_v11 }
  0xda   :  { %702 = vrsqrt.f32 %v217_v12  ;;  %v186_v17 = vpop.xlane.xlu0 %185  ;;  %v657_v20 = vpack.c.bf16 %v1106_v15, %v1106_v15 }
  0xdb   :  { %v693_v21 = vpop.eup %692  ;;  %v189_v26 = vpop.xlane.xlu1 %188  ;;  %v218_v27 = vadd.f32 1e-12, %v186_v17 }
  0xdc   :  { %v695_v32 = vpop.eup %694  ;;  %v219_v33 = vadd.f32 1e-12, %v189_v26  ;;  %436 = vst.msk [vmem:[%s1428_s3] sm:$0xf] %vm435_vm2, %v657_v20  ;;  %v1115_v16 = vmul.f32 %v693_v21, %v843_v18 }
  0xdd   :  { %704 = vrsqrt.f32 %v218_v27  ;;  %v1118_v34 = vmul.f32 %v695_v32, %v848_v19 }
  0xde   :  { %706 = vrsqrt.f32 %v219_v33  ;;  %v192_v37 = vpop.xlane.xlu0 %191  ;;  %v659_v38 = vpack.c.bf16 %v1115_v16, %v1115_v16 }
  0xdf   :  { %v697_v39 = vpop.eup %696  ;;  %v195_v46 = vpop.xlane.xlu1 %194  ;;  %v220_v49 = vadd.f32 1e-12, %v192_v37  ;;  %v658_v50 = vpack.c.bf16 %v1118_v34, %v1118_v34 }
  0xe0   :  { %v699_v51 = vpop.eup %698  ;;  %v221_v52 = vadd.f32 1e-12, %v195_v46  ;;  %438 = vst.msk [vmem:[%s1428_s3 + $0x8] sm:$0xf] %vm435_vm2, %v659_v38  ;;  %v1129_v18 = vmul.f32 %v697_v39, %v858_v23 }
  0xe1   :  { %708 = vrsqrt.f32 %v220_v49  ;;  %437 = vst.msk [vmem:[%s1428_s3 + $0x4] sm:$0xf] %vm435_vm2, %v658_v50  ;;  %v1136_v19 = vmul.f32 %v699_v51, %v863_v24 }
  0xe2   :  { %710 = vrsqrt.f32 %v221_v52  ;;  %v198_v55 = vpop.xlane.xlu0 %197  ;;  %v660_v56 = vpack.c.bf16 %v1129_v18, %v1129_v18 }
  0xe3   :  { %v701_v57 = vpop.eup %700  ;;  %v201_v61 = vpop.xlane.xlu1 %200  ;;  %v222_v62 = vadd.f32 1e-12, %v198_v55  ;;  %v661_v23 = vpack.c.bf16 %v1136_v19, %v1136_v19 }
  0xe4   :  { %v703_v63 = vpop.eup %702  ;;  %v223_v0 = vadd.f32 1e-12, %v201_v61  ;;  %439 = vst.msk [vmem:[%s1428_s3 + $0xc] sm:$0xf] %vm435_vm2, %v660_v56  ;;  %v1147_v24 = vmul.f32 %v701_v57, %v874_v29 }
  0xe5   :  { %712 = vrsqrt.f32 %v222_v62  ;;  %440 = vst.msk [vmem:[%s1428_s3 + $0x10] sm:$0xf] %vm435_vm2, %v661_v23  ;;  %v1154_v1 = vmul.f32 %v703_v63, %v879_v30 }
  0xe6   :  { %714 = vrsqrt.f32 %v223_v0  ;;  %v204_v2 = vpop.xlane.xlu0 %203  ;;  %v662_v3 = vpack.c.bf16 %v1147_v24, %v1147_v24 }
  0xe7   :  { %v705_v6 = vpop.eup %704  ;;  %v207_v9 = vpop.xlane.xlu1 %206  ;;  %v224_v10 = vadd.f32 1e-12, %v204_v2  ;;  %v663_v29 = vpack.c.bf16 %v1154_v1, %v1154_v1 }
  0xe8   :  { %v707_v11 = vpop.eup %706  ;;  %v225_v12 = vadd.f32 1e-12, %v207_v9  ;;  %441 = vst.msk [vmem:[%s1428_s3 + $0x14] sm:$0xf] %vm435_vm2, %v662_v3  ;;  %v1165_v30 = vmul.f32 %v705_v6, %v890_v35 }
  0xe9   :  { %716 = vrsqrt.f32 %v224_v10  ;;  %442 = vst.msk [vmem:[%s1428_s3 + $0x18] sm:$0xf] %vm435_vm2, %v663_v29  ;;  %v1172_v17 = vmul.f32 %v707_v11, %v895_v36 }
  0xea   :  { %718 = vrsqrt.f32 %v225_v12  ;;  %v210_v20 = vpop.xlane.xlu0 %209  ;;  %v664_v21 = vpack.c.bf16 %v1165_v30, %v1165_v30 }
  0xeb   :  { %v709_v26 = vpop.eup %708  ;;  %v226_v27 = vadd.f32 1e-12, %v210_v20  ;;  %v665_v35 = vpack.c.bf16 %v1172_v17, %v1172_v17 }
  0xec   :  { %v711_v32 = vpop.eup %710  ;;  %443 = vst.msk [vmem:[%s1428_s3 + $0x1c] sm:$0xf] %vm435_vm2, %v664_v21  ;;  %v1183_v33 = vmul.f32 %v709_v26, %v906_v41 }
  0xed   :  { %720 = vrsqrt.f32 %v226_v27  ;;  %444 = vst.msk [vmem:[%s1428_s3 + $0x20] sm:$0xf] %vm435_vm2, %v665_v35  ;;  %v1190_v36 = vmul.f32 %v711_v32, %v911_v42 }
  0xee   :  { %v666_v37 = vpack.c.bf16 %v1183_v33, %v1183_v33 }
  0xef   :  { %v713_v38 = vpop.eup %712  ;;  %v667_v39 = vpack.c.bf16 %v1190_v36, %v1190_v36 }
  0xf0   :  { %v715_v46 = vpop.eup %714  ;;  %445 = vst.msk [vmem:[%s1428_s3 + $0x24] sm:$0xf] %vm435_vm2, %v666_v37  ;;  %v1201_v41 = vmul.f32 %v713_v38, %v922_v47 }
  0xf1   :  { %446 = vst.msk [vmem:[%s1428_s3 + $0x28] sm:$0xf] %vm435_vm2, %v667_v39  ;;  %v1208_v42 = vmul.f32 %v715_v46, %v927_v48 }
  0xf2   :  { %v668_v49 = vpack.c.bf16 %v1201_v41, %v1201_v41 }
  0xf3   :  { %v717_v50 = vpop.eup %716  ;;  %v669_v51 = vpack.c.bf16 %v1208_v42, %v1208_v42 }
  0xf4   :  { %v719_v52 = vpop.eup %718  ;;  %447 = vst.msk [vmem:[%s1428_s3 + $0x2c] sm:$0xf] %vm435_vm2, %v668_v49  ;;  %v1219_v47 = vmul.f32 %v717_v50, %v938_v53 }
  0xf5   :  { %448 = vst.msk [vmem:[%s1428_s3 + $0x30] sm:$0xf] %vm435_vm2, %v669_v51  ;;  %v1226_v48 = vmul.f32 %v719_v52, %v943_v54 }
  0xf6   :  { %v670_v55 = vpack.c.bf16 %v1219_v47, %v1219_v47 }
  0xf7   :  { %v721_v56 = vpop.eup %720  ;;  %v671_v57 = vpack.c.bf16 %v1226_v48, %v1226_v48 }
  0xf8   :  { %449 = vst.msk [vmem:[%s1428_s3 + $0x34] sm:$0xf] %vm435_vm2, %v670_v55  ;;  %v1237_v53 = vmul.f32 %v721_v56, %v954_v59 }
  0xf9   :  { %450 = vst.msk [vmem:[%s1428_s3 + $0x38] sm:$0xf] %vm435_vm2, %v671_v57 }
  0xfa   :  { %v672_v54 = vpack.c.bf16 %v1237_v53, %v1237_v53 }
  0xfc   :  { %451 = vst.msk [vmem:[%s1428_s3 + $0x3c] sm:$0xf] %vm435_vm2, %v672_v54 }
 0x106   :  { %v277_v61 = vpop.xlane.xlu1 %276 }
 0x107   :  { %v323_v62 = vadd.f32 1e-12, %v277_v61 }
 0x109   :  { %722 = vrsqrt.f32 %v323_v62 }
 0x10a   :  { %v283_v23 = vpop.xlane.xlu1 %282  ;;  %v280_v63 = vpop.xlane.xlu0 %279 }
 0x10b   :  { %v325_v59 = vadd.f32 1e-12, %v283_v23  ;;  %v324_v0 = vadd.f32 1e-12, %v280_v63 }
 0x10d   :  { %724 = vrsqrt.f32 %v325_v59 }
 0x10e   :  { %726 = vrsqrt.f32 %v324_v0  ;;  %v289_v2 = vpop.xlane.xlu1 %288  ;;  %v286_v3 = vpop.xlane.xlu0 %285 }
 0x10f   :  { %v327_v6 = vadd.f32 1e-12, %v289_v2  ;;  %v326_v9 = vadd.f32 1e-12, %v286_v3 }
 0x111   :  { %728 = vrsqrt.f32 %v327_v6 }
 0x112   :  { %730 = vrsqrt.f32 %v326_v9  ;;  %v295_v10 = vpop.xlane.xlu1 %294  ;;  %v292_v29 = vpop.xlane.xlu0 %291 }
 0x113   :  { %v723_v11 = vpop.eup %722  ;;  %v329_v12 = vadd.f32 1e-12, %v295_v10  ;;  %v328_v20 = vadd.f32 1e-12, %v292_v29 }
 0x114   :  { %v355_v21 = vmul.f32 %v723_v11, %v968_v4 }
 0x115   :  { %732 = vrsqrt.f32 %v329_v12 }
 0x116   :  { %734 = vrsqrt.f32 %v328_v20  ;;  %v301_v26 = vpop.xlane.xlu1 %300  ;;  %v298_v27 = vpop.xlane.xlu0 %297  ;;  %v673_v35 = vpack.c.bf16 %v355_v21, %v355_v21  ;;  %v532_v32 = vmul.f32 %v355_v21, %v1106_v15 }
 0x117   :  { %v725_v37 = vpop.eup %724  ;;  %v331_v38 = vadd.f32 1e-12, %v301_v26  ;;  %v330_v39 = vadd.f32 1e-12, %v298_v27 }
 0x118   :  { %v727_v46 = vpop.eup %726  ;;  %516 = vst.msk [vmem:[%s1429_s4] sm:$0xf] %vm435_vm2, %v673_v35  ;;  %v548_v49 = vsel %vm162_vm0, %v532_v32, 0.0  ;;  %v357_v4 = vmul.f32 %v725_v37, %v971_v5 }
 0x119   :  { %736 = vrsqrt.f32 %v331_v38  ;;  %549 = vadd.xlane.f32.xlu1 %v548_v49  ;;  %v356_v50 = vmul.f32 %v727_v46, %v985_v13 }
 0x11a   :  { %738 = vrsqrt.f32 %v330_v39  ;;  %v307_v51 = vpop.xlane.xlu1 %306  ;;  %v304_v15 = vpop.xlane.xlu0 %303  ;;  %v675_v52 = vpack.c.bf16 %v357_v4, %v357_v4  ;;  %v534_v55 = vmul.f32 %v357_v4, %v1115_v16 }
 0x11b   :  { %v729_v56 = vpop.eup %728  ;;  %v333_v57 = vadd.f32 1e-12, %v307_v51  ;;  %v332_v54 = vadd.f32 1e-12, %v304_v15  ;;  %v533_v61 = vmul.f32 %v356_v50, %v1118_v34  ;;  %v674_v62 = vpack.c.bf16 %v356_v50, %v356_v50 }
 0x11c   :  { %v731_v23 = vpop.eup %730  ;;  %518 = vst.msk [vmem:[%s1429_s4 + $0x8] sm:$0xf] %vm435_vm2, %v675_v52  ;;  %v554_v5 = vsel %vm162_vm0, %v534_v55, 0.0  ;;  %v359_v13 = vmul.f32 %v729_v56, %v1003_v28 }
 0x11d   :  { %740 = vrsqrt.f32 %v333_v57  ;;  %555 = vadd.xlane.f32.xlu1 %v554_v5  ;;  %v551_v16 = vsel %vm162_vm0, %v533_v61, 0.0  ;;  %517 = vst.msk [vmem:[%s1429_s4 + $0x4] sm:$0xf] %vm435_vm2, %v674_v62  ;;  %v358_v34 = vmul.f32 %v731_v23, %v988_v14 }
 0x11e   :  { %742 = vrsqrt.f32 %v332_v54  ;;  %552 = vadd.xlane.f32.xlu0 %v551_v16  ;;  %v313_v63 = vpop.xlane.xlu1 %312  ;;  %v310_v59 = vpop.xlane.xlu0 %309  ;;  %v677_v0 = vpack.c.bf16 %v359_v13, %v359_v13  ;;  %v536_v2 = vmul.f32 %v359_v13, %v1136_v19 }
 0x11f   :  { %v733_v3 = vpop.eup %732  ;;  %v335_v28 = vadd.f32 1e-12, %v313_v63  ;;  %v334_v6 = vadd.f32 1e-12, %v310_v59  ;;  %v535_v9 = vmul.f32 %v358_v34, %v1129_v18  ;;  %v676_v10 = vpack.c.bf16 %v358_v34, %v358_v34 }
 0x120   :  { %v735_v29 = vpop.eup %734  ;;  %520 = vst.msk [vmem:[%s1429_s4 + $0x10] sm:$0xf] %vm435_vm2, %v677_v0  ;;  %v560_v14 = vsel %vm162_vm0, %v536_v2, 0.0  ;;  %v361_v11 = vmul.f32 %v733_v3, %v1021_v44 }
 0x121   :  { %744 = vrsqrt.f32 %v335_v28  ;;  %561 = vadd.xlane.f32.xlu1 %v560_v14  ;;  %v557_v19 = vsel %vm162_vm0, %v535_v9, 0.0  ;;  %519 = vst.msk [vmem:[%s1429_s4 + $0xc] sm:$0xf] %vm435_vm2, %v676_v10  ;;  %v360_v18 = vmul.f32 %v735_v29, %v1006_v31 }
 0x122   :  { %746 = vrsqrt.f32 %v334_v6  ;;  %558 = vadd.xlane.f32.xlu0 %v557_v19  ;;  %v319_v12 = vpop.xlane.xlu1 %318  ;;  %v316_v20 = vpop.xlane.xlu0 %315  ;;  %v679_v21 = vpack.c.bf16 %v361_v11, %v361_v11  ;;  %v538_v26 = vmul.f32 %v361_v11, %v1154_v1 }
 0x123   :  { %v737_v27 = vpop.eup %736  ;;  %v337_v44 = vadd.f32 1e-12, %v319_v12  ;;  %v336_v35 = vadd.f32 1e-12, %v316_v20  ;;  %v537_v32 = vmul.f32 %v360_v18, %v1147_v24  ;;  %v678_v37 = vpack.c.bf16 %v360_v18, %v360_v18 }
 0x124   :  { %v739_v38 = vpop.eup %738  ;;  %522 = vst.msk [vmem:[%s1429_s4 + $0x18] sm:$0xf] %vm435_vm2, %v679_v21  ;;  %v566_v31 = vsel %vm162_vm0, %v538_v26, 0.0  ;;  %v363_v39 = vmul.f32 %v737_v27, %v1039_v58 }
 0x125   :  { %748 = vrsqrt.f32 %v337_v44  ;;  %567 = vadd.xlane.f32.xlu1 %v566_v31  ;;  %v563_v1 = vsel %vm162_vm0, %v537_v32, 0.0  ;;  %521 = vst.msk [vmem:[%s1429_s4 + $0x14] sm:$0xf] %vm435_vm2, %v678_v37  ;;  %v362_v24 = vmul.f32 %v739_v38, %v1024_v45 }
 0x126   :  { %750 = vrsqrt.f32 %v336_v35  ;;  %564 = vadd.xlane.f32.xlu0 %v563_v1  ;;  %v322_v46 = vpop.xlane.xlu0 %321  ;;  %v681_v49 = vpack.c.bf16 %v363_v39, %v363_v39  ;;  %v540_v4 = vmul.f32 %v363_v39, %v1172_v17 }
 0x127   :  { %v741_v50 = vpop.eup %740  ;;  %v338_v51 = vadd.f32 1e-12, %v322_v46  ;;  %v539_v58 = vmul.f32 %v362_v24, %v1165_v30  ;;  %v680_v15 = vpack.c.bf16 %v362_v24, %v362_v24 }
 0x128   :  { %v743_v52 = vpop.eup %742  ;;  %524 = vst.msk [vmem:[%s1429_s4 + $0x20] sm:$0xf] %vm435_vm2, %v681_v49  ;;  %v572_v55 = vsel %vm162_vm0, %v540_v4, 0.0  ;;  %v365_v45 = vmul.f32 %v741_v50, %v1057_v7 }
 0x129   :  { %752 = vrsqrt.f32 %v338_v51  ;;  %573 = vadd.xlane.f32.xlu1 %v572_v55  ;;  %v569_v56 = vsel %vm162_vm0, %v539_v58, 0.0  ;;  %523 = vst.msk [vmem:[%s1429_s4 + $0x1c] sm:$0xf] %vm435_vm2, %v680_v15  ;;  %v364_v30 = vmul.f32 %v743_v52, %v1042_v60 }
 0x12a   :  { %570 = vadd.xlane.f32.xlu0 %v569_v56  ;;  %v683_v17 = vpack.c.bf16 %v365_v45, %v365_v45  ;;  %v542_v57 = vmul.f32 %v365_v45, %v1190_v36 }
 0x12b   :  { %v745_v54 = vpop.eup %744  ;;  %v541_v61 = vmul.f32 %v364_v30, %v1183_v33  ;;  %v682_v62 = vpack.c.bf16 %v364_v30, %v364_v30 }
 0x12c   :  { %v747_v7 = vpop.eup %746  ;;  %526 = vst.msk [vmem:[%s1429_s4 + $0x28] sm:$0xf] %vm435_vm2, %v683_v17  ;;  %v578_v23 = vsel %vm162_vm0, %v542_v57, 0.0  ;;  %v367_v5 = vmul.f32 %v745_v54, %v1075_v22 }
 0x12d   :  { %579 = vadd.xlane.f32.xlu1 %v578_v23  ;;  %v575_v60 = vsel %vm162_vm0, %v541_v61, 0.0  ;;  %525 = vst.msk [vmem:[%s1429_s4 + $0x24] sm:$0xf] %vm435_vm2, %v682_v62  ;;  %v366_v33 = vmul.f32 %v747_v7, %v1060_v8 }
 0x12e   :  { %576 = vadd.xlane.f32.xlu0 %v575_v60  ;;  %v685_v36 = vpack.c.bf16 %v367_v5, %v367_v5  ;;  %v544_v13 = vmul.f32 %v367_v5, %v1208_v42 }
 0x12f   :  { %v749_v16 = vpop.eup %748  ;;  %v543_v34 = vmul.f32 %v366_v33, %v1201_v41  ;;  %v684_v63 = vpack.c.bf16 %v366_v33, %v366_v33 }
 0x130   :  { %v751_v59 = vpop.eup %750  ;;  %528 = vst.msk [vmem:[%s1429_s4 + $0x30] sm:$0xf] %vm435_vm2, %v685_v36  ;;  %v584_v22 = vsel %vm162_vm0, %v544_v13, 0.0  ;;  %v369_v0 = vmul.f32 %v749_v16, %v1093_v40 }
 0x131   :  { %585 = vadd.xlane.f32.xlu1 %v584_v22  ;;  %v581_v8 = vsel %vm162_vm0, %v543_v34, 0.0  ;;  %527 = vst.msk [vmem:[%s1429_s4 + $0x2c] sm:$0xf] %vm435_vm2, %v684_v63  ;;  %v368_v41 = vmul.f32 %v751_v59, %v1078_v25 }
 0x132   :  { %582 = vadd.xlane.f32.xlu0 %v581_v8  ;;  %v687_v42 = vpack.c.bf16 %v369_v0, %v369_v0  ;;  %v546_v2 = vmul.f32 %v369_v0, %v1226_v48 }
 0x133   :  { %v753_v3 = vpop.eup %752  ;;  %v545_v28 = vmul.f32 %v368_v41, %v1219_v47  ;;  %v686_v6 = vpack.c.bf16 %v368_v41, %v368_v41 }
 0x134   :  { %530 = vst.msk [vmem:[%s1429_s4 + $0x38] sm:$0xf] %vm435_vm2, %v687_v42  ;;  %v590_v40 = vsel %vm162_vm0, %v546_v2, 0.0  ;;  %v370_v9 = vmul.f32 %v753_v3, %v1096_v43 }
 0x135   :  { %591 = vadd.xlane.f32.xlu1 %v590_v40  ;;  %v587_v25 = vsel %vm162_vm0, %v545_v28, 0.0  ;;  %529 = vst.msk [vmem:[%s1429_s4 + $0x34] sm:$0xf] %vm435_vm2, %v686_v6 }
 0x136   :  { %588 = vadd.xlane.f32.xlu0 %v587_v25  ;;  %v547_v47 = vmul.f32 %v370_v9, %v1237_v53  ;;  %v688_v48 = vpack.c.bf16 %v370_v9, %v370_v9 }
 0x138   :  { %v593_v10 = vsel %vm162_vm0, %v547_v47, 0.0  ;;  %531 = vst.msk [vmem:[%s1429_s4 + $0x3c] sm:$0xf] %vm435_vm2, %v688_v48 }
 0x13a   :  { %594 = vadd.xlane.f32.xlu0 %v593_v10 }
 0x1a6   :  { %v550_v43 = vpop.xlane.xlu1 %549 }
 0x1a7   :  { %597 = vst.msk [vmem:[%s1430_s5] sm:$0xff] %vm596_vm3, %v550_v43 }
 0x1aa   :  { %v556_v29 = vpop.xlane.xlu1 %555 }
 0x1ab   :  { %599 = vst.msk [vmem:[%s1430_s5 + $0x10] sm:$0xff] %vm596_vm3, %v556_v29  ;;  %v553_v53 = vpop.xlane.xlu0 %552 }
 0x1ac   :  { %598 = vst.msk [vmem:[%s1430_s5 + $0x8] sm:$0xff] %vm596_vm3, %v553_v53 }
 0x1ae   :  { %v562_v14 = vpop.xlane.xlu1 %561 }
 0x1af   :  { %601 = vst.msk [vmem:[%s1430_s5 + $0x20] sm:$0xff] %vm596_vm3, %v562_v14  ;;  %v559_v11 = vpop.xlane.xlu0 %558 }
 0x1b0   :  { %600 = vst.msk [vmem:[%s1430_s5 + $0x18] sm:$0xff] %vm596_vm3, %v559_v11 }
 0x1b2   :  { %v568_v19 = vpop.xlane.xlu1 %567 }
 0x1b3   :  { %603 = vst.msk [vmem:[%s1430_s5 + $0x30] sm:$0xff] %vm596_vm3, %v568_v19  ;;  %v565_v18 = vpop.xlane.xlu0 %564 }
 0x1b4   :  { %602 = vst.msk [vmem:[%s1430_s5 + $0x28] sm:$0xff] %vm596_vm3, %v565_v18 }
 0x1b6   :  { %v574_v12 = vpop.xlane.xlu1 %573 }
 0x1b7   :  { %605 = vst.msk [vmem:[%s1430_s5 + $0x40] sm:$0xff] %vm596_vm3, %v574_v12  ;;  %v571_v20 = vpop.xlane.xlu0 %570 }
 0x1b8   :  { %604 = vst.msk [vmem:[%s1430_s5 + $0x38] sm:$0xff] %vm596_vm3, %v571_v20 }
 0x1ba   :  { %v580_v21 = vpop.xlane.xlu1 %579 }
 0x1bb   :  { %607 = vst.msk [vmem:[%s1430_s5 + $0x50] sm:$0xff] %vm596_vm3, %v580_v21  ;;  %v577_v26 = vpop.xlane.xlu0 %576 }
 0x1bc   :  { %606 = vst.msk [vmem:[%s1430_s5 + $0x48] sm:$0xff] %vm596_vm3, %v577_v26 }
 0x1be   :  { %v586_v27 = vpop.xlane.xlu1 %585 }
 0x1bf   :  { %609 = vst.msk [vmem:[%s1430_s5 + $0x60] sm:$0xff] %vm596_vm3, %v586_v27  ;;  %v583_v44 = vpop.xlane.xlu0 %582 }
 0x1c0   :  { %608 = vst.msk [vmem:[%s1430_s5 + $0x58] sm:$0xff] %vm596_vm3, %v583_v44 }
 0x1c2   :  { %v592_v35 = vpop.xlane.xlu1 %591 }
 0x1c3   :  { %611 = vst.msk [vmem:[%s1430_s5 + $0x70] sm:$0xff] %vm596_vm3, %v592_v35  ;;  %v589_v32 = vpop.xlane.xlu0 %588 }
 0x1c4   :  { %610 = vst.msk [vmem:[%s1430_s5 + $0x68] sm:$0xff] %vm596_vm3, %v589_v32 }
 0x1c7   :  { %v595_v37 = vpop.xlane.xlu0 %594 }
 0x1c8   :  { %612 = vst.msk [vmem:[%s1430_s5 + $0x78] sm:$0xff] %vm596_vm3, %v595_v37 }

</bundles_post_ra>
